<compile_context>
chip_gen: v5e
topology: v5e:2x2
jax: 0.10.0
libtpu: 0.0.40
codegen_flags: <defaults>
</compile_context>

<pallas_src>
import jax
import jax.numpy as jnp
from jax.experimental import pallas as pl
from jax.experimental.pallas import tpu as pltpu


def actor_critic_kernel(obs_ref,
                        w1_ref, b1_ref,
                        w2_ref, b2_ref,
                        wh_ref, bh_ref,
                        out_ref):
    cdt = w1_ref.dtype                     # MXU operand dtype (bf16 by default)
    xT = obs_ref[...]                      # [8, TB]  features x batch (lane-dense)

    # shared: Linear(8,64) + ReLU   -> [64, TB], f32 accumulate
    h1 = jnp.dot(w1_ref[...], xT, preferred_element_type=jnp.float32) + b1_ref[...]
    h1 = jnp.maximum(h1, 0.0)

    # shared: Linear(64,64) + ReLU  -> [64, TB]
    h2 = jnp.dot(w2_ref[...], h1.astype(cdt),
                 preferred_element_type=jnp.float32) + b2_ref[...]
    h2 = jnp.maximum(h2, 0.0)

    # fused heads: rows 0-3 = actor logits, row 4 = value, rows 5-7 = pad -> [8, TB]
    y = jnp.dot(wh_ref[...], h2.astype(cdt),
                preferred_element_type=jnp.float32) + bh_ref[...]

    # softmax over the 4 actor rows (sublane axis); batch stays dense in lanes.
    row = jax.lax.broadcasted_iota(jnp.int32, (8, 1), 0)
    is_actor = row < 4
    logits = jnp.where(is_actor, y, jnp.float32(-1e30))
    m = jnp.max(logits, axis=0, keepdims=True)          # [1, TB]
    e = jnp.exp(logits - m)                             # pad rows underflow to 0
    denom = jnp.sum(e, axis=0, keepdims=True)           # [1, TB]
    probs = e / denom                                   # exact normalization (fix)

    # lane-dense [8, TB] output slab: rows 0-3 probs, row 4 value, rows 5-7 zero.
    out_ref[...] = jnp.where(is_actor, probs,
                             jnp.where(row == 4, y, 0.0)).astype(out_ref.dtype)


def _round_up(x, m):
    return ((x + m - 1) // m) * m


def init_params(key):
    """PyTorch-style Linear init (uniform +/- 1/sqrt(fan_in)), torch [out, in] layout."""
    ks = jax.random.split(key, 8)

    def lin(kw, kb, fan_in, fan_out):
        bound = 1.0 / (fan_in ** 0.5)
        w = jax.random.uniform(kw, (fan_out, fan_in), jnp.float32, -bound, bound)
        b = jax.random.uniform(kb, (fan_out,), jnp.float32, -bound, bound)
        return w, b

    w1, b1 = lin(ks[0], ks[1], 8, 64)
    w2, b2 = lin(ks[2], ks[3], 64, 64)
    wa, ba = lin(ks[4], ks[5], 64, 4)
    wc, bc = lin(ks[6], ks[7], 64, 1)
    return dict(w1=w1, b1=b1, w2=w2, b2=b2, wa=wa, ba=ba, wc=wc, bc=bc)


def prepare_kernel_params(p, compute_dtype=jnp.bfloat16):
    """Build kernel-ready params ONCE (not per forward): fused actor+critic head,
    MXU-operand dtype cast, biases kept f32 (added after the f32-accumulated matmul)."""
    hidden = p["w1"].shape[0]
    n_act = p["wa"].shape[0]
    pad = 8 - n_act - 1
    wh = jnp.concatenate(
        [p["wa"], p["wc"], jnp.zeros((pad, hidden), jnp.float32)], axis=0)   # [8, 64]
    bh = jnp.concatenate(
        [p["ba"], p["bc"], jnp.zeros((pad,), jnp.float32)], axis=0)          # [8]
    return dict(
        w1=p["w1"].astype(compute_dtype),
        b1=p["b1"].reshape(hidden, 1).astype(jnp.float32),
        w2=p["w2"].astype(compute_dtype),
        b2=p["b2"].reshape(hidden, 1).astype(jnp.float32),
        wh=wh.astype(compute_dtype),
        bh=bh.reshape(8, 1).astype(jnp.float32),
    )


def actor_critic_forward(obs, kp, *, block_b=16384, min_steps=2):
    """obs: [B, 8] f32 -> (action_probs [B, 4] f32, v_value [B, 1] f32).

    kp: params from prepare_kernel_params (fused head, feature-major friendly)."""
    B = obs.shape[0]
    compute_dtype = kp["w1"].dtype
    hidden = kp["w1"].shape[0]

    # Batch tile: multiple of 128 (batch lives in the lane axis), large enough to
    # amortize per-grid-step overhead, but keep >= min_steps grid steps so both
    # TensorCores get work on v7x.
    TB = max(128, min(block_b, _round_up(-(-B // max(1, min_steps)), 128)))
    Bp = _round_up(B, TB)

    # Feature-major input [8, Bp]; wrapper-side transpose+cast is one tiny extra
    # HBM pass (fine on v6e/v7x).
    # TODO(synk): on v5e, fold this transpose into the kernel via the (idle) XLU
    # to avoid the extra HBM pass over obs.
    obsT = obs.T.astype(compute_dtype)
    if Bp != B:
        obsT = jnp.pad(obsT, ((0, 0), (0, Bp - B)))

    const = lambda i: (0, 0)   # weights/biases: same block every step -> VMEM-resident

    # VMEM budget: double-buffered in/out tiles + two f32 hidden activations + headroom.
    itm = jnp.dtype(compute_dtype).itemsize
    est = 2 * 8 * TB * itm + 2 * 8 * TB * 4 + 2 * hidden * TB * 4 + (4 << 20)
    vmem_limit = int(min(max(est, 16 << 20), 48 << 20))

    out = pl.pallas_call(
        actor_critic_kernel,
        out_shape=jax.ShapeDtypeStruct((8, Bp), jnp.float32),
        grid=(Bp // TB,),
        in_specs=[
            pl.BlockSpec((8, TB), lambda i: (0, i)),        # obs tile (feature-major)
            pl.BlockSpec((hidden, 8), const),               # w1
            pl.BlockSpec((hidden, 1), const),               # b1
            pl.BlockSpec((hidden, hidden), const),          # w2
            pl.BlockSpec((hidden, 1), const),               # b2
            pl.BlockSpec((8, hidden), const),               # fused head weights
            pl.BlockSpec((8, 1), const),                    # fused head bias
        ],
        out_specs=pl.BlockSpec((8, TB), lambda i: (0, i)),
        compiler_params=pltpu.CompilerParams(
            dimension_semantics=("parallel",),              # v7x: shard batch across TCs
            vmem_limit_bytes=vmem_limit,
        ),
    )(obsT, kp["w1"], kp["b1"], kp["w2"], kp["b2"], kp["wh"], kp["bh"])

    probs = out[:4, :B].T       # [B, 4]
    v = out[4:5, :B].T          # [B, 1]
    return probs, v


def reference_forward(obs, p):
    h1 = jnp.maximum(obs @ p["w1"].T + p["b1"], 0.0)
    h2 = jnp.maximum(h1 @ p["w2"].T + p["b2"], 0.0)
    logits = h2 @ p["wa"].T + p["ba"]
    probs = jax.nn.softmax(logits, axis=-1)
    v = h2 @ p["wc"].T + p["bc"]
    return probs, v


if __name__ == "__main__":
    key = jax.random.PRNGKey(0)
    k_obs, k_params = jax.random.split(key)

    B = 256  # small demo batch; production rollouts should use B in the thousands
    obs = jax.random.normal(k_obs, (B, 8), dtype=jnp.float32)
    params = init_params(k_params)
    kparams = prepare_kernel_params(params, compute_dtype=jnp.bfloat16)

    # block_b=128 here just to exercise a multi-step grid (grid=(2,)) at small B;
    # the default block_b=16384 is the production setting.
    probs, v = actor_critic_forward(obs, kparams, block_b=128, min_steps=2)
    probs = jax.block_until_ready(probs)
    v = jax.block_until_ready(v)

    # sanity check against pure-JAX f32 reference (bf16 MXU operands -> ~1e-2 tol)
    ref_probs, ref_v = reference_forward(obs, params)
    assert probs.shape == (B, 4) and v.shape == (B, 1)
    assert jnp.allclose(jnp.sum(probs, axis=-1), 1.0, atol=1e-5)   # exact normalization
    assert jnp.allclose(probs, ref_probs, atol=3e-2, rtol=3e-2)
    assert jnp.allclose(v, ref_v, atol=3e-2, rtol=3e-2)

    print("KERNEL_OK")
</pallas_src>

<mosaic_0001>
module attributes {stable_mosaic.version = 11 : i64} {
  func.func @actor_critic_kernel(%arg0: i32, %arg1: memref<8x128xbf16, #tpu.memory_space<vmem>>, %arg2: memref<64x8xbf16, #tpu.memory_space<vmem>>, %arg3: memref<64x1xf32, #tpu.memory_space<vmem>>, %arg4: memref<64x64xbf16, #tpu.memory_space<vmem>>, %arg5: memref<64x1xf32, #tpu.memory_space<vmem>>, %arg6: memref<8x64xbf16, #tpu.memory_space<vmem>>, %arg7: memref<8x1xf32, #tpu.memory_space<vmem>>, %arg8: memref<8x128xf32, #tpu.memory_space<vmem>>) attributes {dimension_semantics = [#tpu.dimension_semantics<parallel>], iteration_bounds = array<i64: 2>, scalar_prefetch = 0 : i64, scratch_operands = 0 : i64, tpu.core_type = #tpu.core_type<tc>, window_params = [{transform_indices = @transform_0, window_bounds = array<i64: 8, 128>}, {pipeline_mode = #tpu.pipeline_mode<synchronous>, transform_indices = @transform_1, window_bounds = array<i64: 64, 8>}, {pipeline_mode = #tpu.pipeline_mode<synchronous>, transform_indices = @transform_2, window_bounds = array<i64: 64, 1>}, {pipeline_mode = #tpu.pipeline_mode<synchronous>, transform_indices = @transform_3, window_bounds = array<i64: 64, 64>}, {pipeline_mode = #tpu.pipeline_mode<synchronous>, transform_indices = @transform_4, window_bounds = array<i64: 64, 1>}, {pipeline_mode = #tpu.pipeline_mode<synchronous>, transform_indices = @transform_5, window_bounds = array<i64: 8, 64>}, {pipeline_mode = #tpu.pipeline_mode<synchronous>, transform_indices = @transform_6, window_bounds = array<i64: 8, 1>}, {transform_indices = @transform_7, window_bounds = array<i64: 8, 128>}]} {
    %c0 = arith.constant 0 : index
    %c0_0 = arith.constant 0 : index
    %0 = vector.load %arg1[%c0, %c0_0] : memref<8x128xbf16, #tpu.memory_space<vmem>>, vector<8x128xbf16>
    %c0_1 = arith.constant 0 : index
    %c0_2 = arith.constant 0 : index
    %1 = vector.load %arg2[%c0_1, %c0_2] : memref<64x8xbf16, #tpu.memory_space<vmem>>, vector<64x8xbf16>
    %cst = arith.constant dense<0.000000e+00> : vector<64x128xf32>
    %2 = tpu.matmul %1, %0, %cst {dimension_numbers = #tpu.dot_dimension_numbers<[1], [0], [0], [1], [0, 0, 1, 1], [], []>} : vector<64x8xbf16>, vector<8x128xbf16>, vector<64x128xf32> -> vector<64x128xf32>
    %c0_3 = arith.constant 0 : index
    %c0_4 = arith.constant 0 : index
    %3 = vector.load %arg3[%c0_3, %c0_4] : memref<64x1xf32, #tpu.memory_space<vmem>>, vector<64x1xf32>
    %4 = vector.broadcast %3 : vector<64x1xf32> to vector<64x128xf32>
    %5 = arith.addf %2, %4 : vector<64x128xf32>
    %cst_5 = arith.constant 0.000000e+00 : f32
    %6 = vector.broadcast %cst_5 : f32 to vector<64x128xf32>
    %7 = arith.maximumf %5, %6 : vector<64x128xf32>
    %c0_6 = arith.constant 0 : index
    %c0_7 = arith.constant 0 : index
    %8 = vector.load %arg4[%c0_6, %c0_7] : memref<64x64xbf16, #tpu.memory_space<vmem>>, vector<64x64xbf16>
    %9 = arith.truncf %7 : vector<64x128xf32> to vector<64x128xbf16>
    %cst_8 = arith.constant dense<0.000000e+00> : vector<64x128xf32>
    %10 = tpu.matmul %8, %9, %cst_8 {dimension_numbers = #tpu.dot_dimension_numbers<[1], [0], [0], [1], [0, 0, 1, 1], [], []>} : vector<64x64xbf16>, vector<64x128xbf16>, vector<64x128xf32> -> vector<64x128xf32>
    %c0_9 = arith.constant 0 : index
    %c0_10 = arith.constant 0 : index
    %11 = vector.load %arg5[%c0_9, %c0_10] : memref<64x1xf32, #tpu.memory_space<vmem>>, vector<64x1xf32>
    %12 = vector.broadcast %11 : vector<64x1xf32> to vector<64x128xf32>
    %13 = arith.addf %10, %12 : vector<64x128xf32>
    %cst_11 = arith.constant 0.000000e+00 : f32
    %14 = vector.broadcast %cst_11 : f32 to vector<64x128xf32>
    %15 = arith.maximumf %13, %14 : vector<64x128xf32>
    %c0_12 = arith.constant 0 : index
    %c0_13 = arith.constant 0 : index
    %16 = vector.load %arg6[%c0_12, %c0_13] : memref<8x64xbf16, #tpu.memory_space<vmem>>, vector<8x64xbf16>
    %17 = arith.truncf %15 : vector<64x128xf32> to vector<64x128xbf16>
    %cst_14 = arith.constant dense<0.000000e+00> : vector<8x128xf32>
    %18 = tpu.matmul %16, %17, %cst_14 {dimension_numbers = #tpu.dot_dimension_numbers<[1], [0], [0], [1], [0, 0, 1, 1], [], []>} : vector<8x64xbf16>, vector<64x128xbf16>, vector<8x128xf32> -> vector<8x128xf32>
    %c0_15 = arith.constant 0 : index
    %c0_16 = arith.constant 0 : index
    %19 = vector.load %arg7[%c0_15, %c0_16] : memref<8x1xf32, #tpu.memory_space<vmem>>, vector<8x1xf32>
    %20 = vector.broadcast %19 : vector<8x1xf32> to vector<8x128xf32>
    %21 = arith.addf %18, %20 : vector<8x128xf32>
    %22 = tpu.iota {dimensions = array<i32: 0>} : vector<8x1xi32>
    %c4_i32 = arith.constant 4 : i32
    %23 = vector.broadcast %c4_i32 : i32 to vector<8x1xi32>
    %24 = arith.cmpi slt, %22, %23 : vector<8x1xi32>
    %cst_17 = arith.constant -1.000000e+30 : f32
    %25 = vector.shape_cast %24 : vector<8x1xi1> to vector<8x1xi1>
    %26 = vector.broadcast %25 : vector<8x1xi1> to vector<8x128xi1>
    %27 = vector.broadcast %cst_17 : f32 to vector<8x128xf32>
    %28 = arith.select %26, %21, %27 : vector<8x128xi1>, vector<8x128xf32>
    %cst_18 = arith.constant dense<0xFF800000> : vector<128xf32>
    %29 = vector.multi_reduction <maximumf>, %28, %cst_18 [0] : vector<8x128xf32> to vector<128xf32>
    %30 = vector.shape_cast %29 : vector<128xf32> to vector<1x128xf32>
    %31 = vector.broadcast %30 : vector<1x128xf32> to vector<8x128xf32>
    %32 = arith.subf %28, %31 : vector<8x128xf32>
    %33 = math.exp %32 : vector<8x128xf32>
    %cst_19 = arith.constant dense<0.000000e+00> : vector<128xf32>
    %34 = vector.multi_reduction <add>, %33, %cst_19 [0] : vector<8x128xf32> to vector<128xf32>
    %35 = vector.shape_cast %34 : vector<128xf32> to vector<1x128xf32>
    %36 = vector.broadcast %35 : vector<1x128xf32> to vector<8x128xf32>
    %37 = arith.divf %33, %36 : vector<8x128xf32>
    %c4_i32_20 = arith.constant 4 : i32
    %38 = vector.broadcast %c4_i32_20 : i32 to vector<8x1xi32>
    %39 = arith.cmpi eq, %22, %38 : vector<8x1xi32>
    %cst_21 = arith.constant 0.000000e+00 : f32
    %40 = vector.shape_cast %39 : vector<8x1xi1> to vector<8x1xi1>
    %41 = vector.broadcast %40 : vector<8x1xi1> to vector<8x128xi1>
    %42 = vector.broadcast %cst_21 : f32 to vector<8x128xf32>
    %43 = arith.select %41, %21, %42 : vector<8x128xi1>, vector<8x128xf32>
    %44 = vector.shape_cast %24 : vector<8x1xi1> to vector<8x1xi1>
    %45 = vector.broadcast %44 : vector<8x1xi1> to vector<8x128xi1>
    %46 = arith.select %45, %37, %43 : vector<8x128xi1>, vector<8x128xf32>
    %c0_22 = arith.constant 0 : index
    %c0_23 = arith.constant 0 : index
    %47 = vector.load %arg8[%c0_22, %c0_23] : memref<8x128xf32, #tpu.memory_space<vmem>>, vector<8x128xf32>
    tpu.vector_store %arg8[%c0_22, %c0_23], %46 {strides = array<i32>} : memref<8x128xf32, #tpu.memory_space<vmem>>, vector<8x128xf32>,
    return
  }
  func.func @transform_0(%arg0: i32) -> (i32, i32) {
    %c0_i32 = arith.constant 0 : i32
    %c0_i32_0 = arith.constant 0 : i32
    return %c0_i32, %arg0 : i32, i32
  }
  func.func @transform_1(%arg0: i32) -> (i32, i32) {
    %c0_i32 = arith.constant 0 : i32
    %c0_i32_0 = arith.constant 0 : i32
    %c0_i32_1 = arith.constant 0 : i32
    return %c0_i32, %c0_i32_0 : i32, i32
  }
  func.func @transform_2(%arg0: i32) -> (i32, i32) {
    %c0_i32 = arith.constant 0 : i32
    %c0_i32_0 = arith.constant 0 : i32
    %c0_i32_1 = arith.constant 0 : i32
    return %c0_i32, %c0_i32_0 : i32, i32
  }
  func.func @transform_3(%arg0: i32) -> (i32, i32) {
    %c0_i32 = arith.constant 0 : i32
    %c0_i32_0 = arith.constant 0 : i32
    %c0_i32_1 = arith.constant 0 : i32
    return %c0_i32, %c0_i32_0 : i32, i32
  }
  func.func @transform_4(%arg0: i32) -> (i32, i32) {
    %c0_i32 = arith.constant 0 : i32
    %c0_i32_0 = arith.constant 0 : i32
    %c0_i32_1 = arith.constant 0 : i32
    return %c0_i32, %c0_i32_0 : i32, i32
  }
  func.func @transform_5(%arg0: i32) -> (i32, i32) {
    %c0_i32 = arith.constant 0 : i32
    %c0_i32_0 = arith.constant 0 : i32
    %c0_i32_1 = arith.constant 0 : i32
    return %c0_i32, %c0_i32_0 : i32, i32
  }
  func.func @transform_6(%arg0: i32) -> (i32, i32) {
    %c0_i32 = arith.constant 0 : i32
    %c0_i32_0 = arith.constant 0 : i32
    %c0_i32_1 = arith.constant 0 : i32
    return %c0_i32, %c0_i32_0 : i32, i32
  }
  func.func @transform_7(%arg0: i32) -> (i32, i32) {
    %c0_i32 = arith.constant 0 : i32
    %c0_i32_0 = arith.constant 0 : i32
    return %c0_i32, %arg0 : i32, i32
  }
}

</mosaic_0001>

<bundles_post_ra>
// kernel: tpu_custom_call.1
= control target key start
LH: loop header
LB: loop body
LE: loop exit
PB: predicated region body
PF: predicated region fallthrough
CT: control target
= control target key end

     0   :  { %12 = vsyncpa [#allocation3], 0  ;;  %s1074_s0 = inlined_call_operand.vmem [shape: bf16[8,256], index: 0, kind: input, shape index: {}]   ;;  %s1075_s1 = inlined_call_operand.vmem [shape: bf16[64,8], index: 1, kind: input, shape index: {}]   ;;  %s1076_s2 = inlined_call_operand.vmem [shape: f32[64,1], index: 2, kind: input, shape index: {}]   ;;  %s1077_s3 = inlined_call_operand.vmem [shape: bf16[64,64], index: 3, kind: input, shape index: {}]   ;;  %s1078_s4 = inlined_call_operand.vmem [shape: f32[64,1], index: 4, kind: input, shape index: {}]   ;;  %s1079_s5 = inlined_call_operand.vmem [shape: bf16[8,64], index: 5, kind: input, shape index: {}]   ;;  %s1080_s6 = inlined_call_operand.vmem [shape: f32[8,1], index: 6, kind: input, shape index: {}]   ;;  %s1081_s7 = inlined_call_operand.hbm [shape: f32[8,256], index: 7, kind: output, shape index: {}]  }
   0x1   :  { %14 = vsyncpa [#allocation3 + $0x1], 0  ;;  %s900_s24 = smov 0   ;;  %s902_s25 = smov 0  }
   0x2   :  { %s904_s26 = smov 0   ;;  %s906_s27 = smov 0  }
   0x3 LB: > { %s921_s28 = sadd.s32 4294967295, %s857_s27   ;;  %s680_s29 = sadd.s32 4294967294, %s857_s27   ;;  %s857_s27 = sphi %s906_s27, %s1087_s27   ;;  %s853_s26 = sphi %s904_s26, %s1086_s26   ;;  %s849_s25 = sphi %s902_s25, %s1085_s25   ;;  %s845_s24 = sphi %s900_s24, %s1084_s24  }
   0x4   : > { %s925_s30 = sadd.s32 1, %s857_s27   ;;  %s179_s8 = sadd.s32 1, %s853_s26 }
   0x5   : > { %s176_s9 = ssub.s32 %s857_s27, %s925_s30  ;;  %p189_p0 = scmp.ne.s32.totalorder %s853_s26, %s849_s25 }
   0x6   : > { %p177_p1 = scmp.eq.s32.totalorder %s176_s9, 0  ;;  %p190_p2 = scmp.eq.s32.totalorder %s921_s28, 1 }
   0x7   : > { %p195_p3 = scmp.ne.s32.totalorder %s849_s25, %s845_s24  ;;  %p196_p4 = scmp.eq.s32.totalorder %s680_s29, 1 }
   0x8   : > { %s936_s10 = scalar_select %p177_p1, %s853_s26, %s179_s8  }
   0x9   : > { %p938_p5 = por %p190_p2, %p189_p0  ;;  %p942_p6 = por %p196_p4, %p195_p3 }
   0xa   : > { %p683_p7 = scmp.ge.s32.totalorder %s857_s27, 1  ;;  %p239_p8 = scmp.lt.s32.totalorder %s857_s27, 3 }
   0xc   : > { %p240_p9 = pnand %p683_p7, %p239_p8 }
   0xd   : > { %p270_p10 = scmp.lt.s32.totalorder (!%p240_p9), %s921_s28, 1  ;;  %s267_s14 = sand.u32 (!%p240_p9), 1, %s849_s25  }
   0xe   : > { %243 = sbr.rel (%p240_p9) target bundleno = 582 (0x246), region = 48  ;;  %s684_s15 = sshll.u32 (!%p240_p9), %s267_s14, 3 }
   0xf   : > { %s728_s16 = sshll.u32 (!%p240_p9), %s921_s28, 3  ;;  %s269_s20 = scalar_lea.vmem (!%p240_p9), [#allocation2], %s684_s15 }
  0x10   : > { %s616_s19 = scalar_lea.hbm (!%p240_p9), %s1081_s7, %s728_s16  ;;  %s815_s13 = scalar_lea.hbm (!%p240_p9), %s1081_s7, 16 }
  0x11   : > { %s620_s22 = sshll.u32 (!%p240_p9), %s616_s19, 4  ;;  %s621_s22 = int_to_ptr.hbm [resolvable:$true] %s620_s22 }
  0x12   : > { %s809_s23 = sshra.s32 (!%p240_p9), %s621_s22, 4  ;;  %s810_s23 = int_to_ptr.hbm [resolvable:$true] %s809_s23 }
  0x13   : > { %v290_v0 = vld [vmem:[%s1076_s2 + $0x30] sm:$0xff]  ;;  %v859_v1 = vmov 0   ;;  %v288_v2 = vld [vmem:[%s1076_s2 + $0x20] sm:$0xff]  ;;  %s271_s17 = scalar_select %p270_p10, %s921_s28, 1  ;;  %vm365_vm0 = vcmask 1043456   ;;  %v291_v6 = vld [vmem:[%s1076_s2 + $0x38] sm:$0xff] }
  0x14   : > { %788 = vset.pattern.permute.xlu0 %v859_v1  ;;  %789 = vset.pattern.permute.xlu1 %v859_v1  ;;  %v731_v4 = vld [vmem:[%s1075_s1] sm:$0xff]  ;;  %v289_v7 = vld [vmem:[%s1076_s2 + $0x28] sm:$0xff]  ;;  %v734_v8 = vld [vmem:[%s1075_s1 + $0x18] sm:$0xff]  ;;  %vm352_vm1 = vcmask 64512   ;;  %vm486_vm2 = vcmask 523264   ;;  %s606_s28 = scalar_lea.sflag [#allocation3], %s267_s14  ;;  %p816_p0 = scmp.lt.s32.totalorder %s810_s23, %s1081_s7 }
  0x15   : > { %324 = vperm.xlu0 %788, %v290_v0   ;;  %314 = vperm.xlu1 %789, %v288_v2   ;;  %s685_s18 = sshll.u32 %s271_s17, 2  ;;  %v286_v9 = vld [vmem:[%s1076_s2 + $0x10] sm:$0xff]  ;;  %v284_v10 = vld [vmem:[%s1076_s2] sm:$0xff]  ;;  %v285_v11 = vld [vmem:[%s1076_s2 + $0x8] sm:$0xff]  ;;  %s811_s29 = scalar_lea.hbm %s810_s23, 8 }
  0x16   : > { %790 = vset.pattern.permute.xlu2 %v859_v1  ;;  %s273_s21 = scalar_lea.vmem %s1074_s0, %s685_s18  ;;  %v287_v12 = vld [vmem:[%s1076_s2 + $0x18] sm:$0xff]  ;;  %v732_v13 = vld [vmem:[%s1075_s1 + $0x8] sm:$0xff]  ;;  %v422_v15 = vld [vmem:[%s1078_s4 + $0x20] sm:$0xff]  ;;  %p812_p11 = scmp.ne.s32.totalorder %s810_s23, %s811_s29 }
  0x17   : > { %v275_v3 = vld [vmem:[%s273_s21] sm:$0xf]  ;;  %304 = vperm.xlu2 %790, %v286_v9   ;;  %v425_v14 = vld [vmem:[%s1078_s4 + $0x38] sm:$0xff]  ;;  %v424_v16 = vld [vmem:[%s1078_s4 + $0x30] sm:$0xff]  ;;  %s618_s21 = sshll.u32 %s269_s20, 4  ;;  %p817_p1 = scmp.lt.s32.totalorder %s815_s13, %s811_s29  ;;  %s619_s21 = int_to_ptr.vmem [resolvable:$true] %s618_s21 }
  0x18   : > { %v367_v5 = vsel %vm365_vm0, %v275_v3, 0  ;;  %v420_v17 = vld [vmem:[%s1078_s4 + $0x10] sm:$0xff]  ;;  %v421_v18 = vld [vmem:[%s1078_s4 + $0x18] sm:$0xff]  ;;  %v423_v19 = vld [vmem:[%s1078_s4 + $0x28] sm:$0xff]  ;;  %p813_p12 = pnand %p812_p11, %p938_p5 }
  0x19   : > { %376 = vmatpush.bf16.msra.mxu0 %v367_v5  ;;  %739 = vmatpush.bf16.msra.mxu1 %v367_v5  ;;  %v733_v20 = vld [vmem:[%s1075_s1 + $0x10] sm:$0xff]  ;;  %v419_v21 = vld [vmem:[%s1078_s4 + $0x8] sm:$0xff]  ;;  %v541_v22 = vld [vmem:[%s1080_s6] sm:$0xff]  ;;  %p818_p2 = por %p817_p1, %p816_p0 }
  0x1a   : > { %v418_v23 = vld [vmem:[%s1078_s4] sm:$0xff]  ;;  %v736_v61 = vld [vmem:[%s1077_s3 + $0x8] sm:$0xff]  ;;  %v737_v62 = vld [vmem:[%s1077_s3 + $0x10] sm:$0xff]  ;;  %p814_p13 = pneg %p813_p12 }
  0x1b   : > { %v735_v60 = vld [vmem:[%s1077_s3] sm:$0xff]  ;;  %v738_v63 = vld [vmem:[%s1077_s3 + $0x18] sm:$0xff] }
  0x1c   : > { %702 = vmatmul.msk.bf16.vlgmr.msra.gmra.mxu0 %vm352_vm1, %v731_v4  ;;  %705 = vmatmul.msk.bf16.vlgmr.msra.gmra.mxu1 %vm352_vm1, %v734_v8  ;;  %p819_p3 = pnand %p818_p2, %p814_p13 }
  0x1d   : > { %329 = vperm.xlu0 %788, %v291_v6   ;;  %319 = vperm.xlu1 %789, %v289_v7  }
  0x1f   : > { %309 = vperm.xlu2 %790, %v287_v12  }
  0x25   : > { %294 = vperm.xlu0 %788, %v284_v10   ;;  %299 = vperm.xlu1 %789, %v285_v11  }
  0x27   : > { %458 = vperm.xlu2 %790, %v424_v16  }
  0x2c   : > { %703 = vmatmul.msk.bf16.gmra.mxu0 %vm352_vm1, %v732_v13 }
  0x2d   : > { %463 = vperm.xlu0 %788, %v425_v14   ;;  %448 = vperm.xlu1 %789, %v422_v15  }
  0x2f   : > { %453 = vperm.xlu2 %790, %v423_v19  }
  0x35   : > { %438 = vperm.xlu0 %788, %v420_v17   ;;  %443 = vperm.xlu1 %789, %v421_v18  }
  0x37   : > { %428 = vperm.xlu2 %790, %v418_v23  }
  0x3c   : > { %704 = vmatmul.msk.bf16.gmra.mxu0 %vm352_vm1, %v733_v20 }
  0x3d   : > { %433 = vperm.xlu0 %788, %v419_v21   ;;  %544 = vperm.xlu1 %789, %v541_v22  }
  0x71   : > { %v305_v38 = vpop.permute.xlu2 %304 }
  0x79   : > { %v310_v42 = vpop.permute.xlu2 %309 }
  0x81   : > { %v459_v3 = vpop.permute.xlu2 %458 }
  0x87   : > { %v325_v24 = vpop.permute.xlu0 %324  ;;  %v315_v36 = vpop.permute.xlu1 %314 }
  0x89   : > { %v454_v10 = vpop.permute.xlu2 %453 }
  0x8f   : > { %v330_v28 = vpop.permute.xlu0 %329  ;;  %v320_v39 = vpop.permute.xlu1 %319 }
  0x97   : > { %v300_v46 = vpop.permute.xlu1 %299  ;;  %v295_v50 = vpop.permute.xlu0 %294 }
  0x99   : > { %v378_v25 = vpop.f32.mrf.mxu0  ;;  %v393_v26 = vpop.f32.mrf.mxu1 }
  0x9a   : > { %v394_v27 = vadd.f32 %v393_v26, %v325_v24  ;;  %v379_v54 = vadd.f32 %v378_v25, %v295_v50 }
  0x9c   : > { %v404_v31 = vmax.f32 %v394_v27, 0.0  ;;  %v398_v58 = vmax.f32 %v379_v54, 0.0 }
  0x9f   : > { %v464_v2 = vpop.permute.xlu0 %463  ;;  %v449_v6 = vpop.permute.xlu1 %448 }
  0xa1   : > { %v380_v29 = vpop.f32.mrf.mxu0  ;;  %v395_v30 = vpop.f32.mrf.mxu1 }
  0xa2   : > { %v396_v32 = vadd.f32 %v395_v30, %v330_v28  ;;  %v381_v51 = vadd.f32 %v380_v29, %v300_v46  ;;  %v429_v29 = vpop.permute.xlu2 %428 }
  0xa4   : > { %v405_v33 = vmax.f32 %v396_v32, 0.0  ;;  %v399_v56 = vmax.f32 %v381_v51, 0.0 }
  0xa6   : > { %v417_v34 = vpack.c.bf16 %v405_v33, %v404_v31  ;;  %v414_v59 = vpack.c.bf16 %v399_v56, %v398_v58 }
  0xa7   : > { %v439_v8 = vpop.permute.xlu0 %438  ;;  %v444_v18 = vpop.permute.xlu1 %443 }
  0xa8   : > { %503 = vmatpush.bf16.msrb.mxu1 %v417_v34  ;;  %740 = vmatpush.bf16.msra.mxu2 %v417_v34 }
  0xa9   : > { %v383_v35 = vpop.f32.mrf.mxu0  ;;  %741 = vmatpush.bf16.msra.mxu3 %v417_v34 }
  0xaa   : > { %v384_v47 = vadd.f32 %v383_v35, %v305_v38 }
  0xac   : > { %v400_v55 = vmax.f32 %v384_v47, 0.0 }
  0xaf   : > { %v434_v25 = vpop.permute.xlu0 %433 }
  0xb1   : > { %v385_v37 = vpop.f32.mrf.mxu0 }
  0xb2   : > { %v386_v44 = vadd.f32 %v385_v37, %v310_v42  ;;  %v563_v37 = vlaneseq }
  0xb4   : > { %v401_v52 = vmax.f32 %v386_v44, 0.0  ;;  %v564_v38 = vshrl.u32 %v563_v37, 7 }
  0xb6   : > { %v415_v57 = vpack.c.bf16 %v401_v52, %v400_v55  ;;  %vm565_vm3 = vcmp.lt.s32.totalorder %v564_v38, 4  ;;  %vm599_vm7 = vcmp.eq.s32.totalorder %v564_v38, 4 }
  0xb9   : > { %v388_v40 = vpop.f32.mrf.mxu0 }
  0xba   : > { %v389_v41 = vadd.f32 %v388_v40, %v315_v36  ;;  %v536_v36 = vld [vmem:[%s1079_s5] sm:$0xf] }
  0xbc   : > { %v402_v48 = vmax.f32 %v389_v41, 0.0 }
  0xc1   : > { %v390_v43 = vpop.f32.mrf.mxu0 }
  0xc2   : > { %v391_v45 = vadd.f32 %v390_v43, %v320_v39  ;;  %v545_v39 = vpop.permute.xlu1 %544 }
  0xc4   : > { %v403_v49 = vmax.f32 %v391_v45, 0.0 }
  0xc6   : > { %v416_v53 = vpack.c.bf16 %v403_v49, %v402_v48 }
  0xc8   : > { %504 = vmatpush.bf16.msrb.mxu1 %v416_v53  ;;  %742 = vmatpush.bf16.msra.mxu2 %v416_v53 }
  0xc9   : > { %743 = vmatpush.bf16.msra.mxu3 %v416_v53 }
  0xcc   : > { %505 = vmatpush.bf16.msrb.mxu1 %v415_v57  ;;  %744 = vmatpush.bf16.msra.mxu2 %v415_v57 }
  0xcd   : > { %745 = vmatpush.bf16.msra.mxu3 %v415_v57 }
  0xd0   : > { %506 = vmatpush.bf16.msrb.mxu1 %v414_v59  ;;  %746 = vmatpush.bf16.msra.mxu2 %v414_v59 }
  0xd1   : > { %747 = vmatpush.bf16.msra.mxu3 %v414_v59 }
  0xd3   : > { %722 = vmatmul.msk.bf16.vlgmr.msrb.gmra.mxu1 %vm486_vm2, %v735_v60  ;;  %723 = vmatmul.msk.bf16.vlgmr.msra.gmra.mxu2 %vm486_vm2, %v736_v61 }
  0xd4   : > { %724 = vmatmul.msk.bf16.vlgmr.msra.gmra.mxu3 %vm486_vm2, %v737_v62 }
  0xe4   : > { %725 = vmatmul.msk.bf16.gmra.mxu3 %vm486_vm2, %v738_v63 }
 0x150   : > { %v508_v7 = vpop.f32.mrf.mxu1 }
 0x151   : > { %v509_v30 = vadd.f32 %v508_v7, %v429_v29 }
 0x153   : > { %v528_v34 = vmax.f32 %v509_v30, 0.0 }
 0x156   : > { %v513_v4 = vpop.f32.mrf.mxu2 }
 0x157   : > { %v518_v0 = vpop.f32.mrf.mxu3  ;;  %v514_v23 = vadd.f32 %v513_v4, %v439_v8 }
 0x158   : > { %v519_v15 = vadd.f32 %v518_v0, %v449_v6  ;;  %v510_v22 = vpop.f32.mrf.mxu1 }
 0x159   : > { %v511_v26 = vadd.f32 %v510_v22, %v434_v25  ;;  %v530_v31 = vmax.f32 %v514_v23, 0.0 }
 0x15a   : > { %v532_v24 = vmax.f32 %v519_v15, 0.0 }
 0x15b   : > { %v529_v32 = vmax.f32 %v511_v26, 0.0 }
 0x15d   : > { %v537_v35 = vpack.c.bf16 %v529_v32, %v528_v34 }
 0x15e   : > { %v515_v14 = vpop.f32.mrf.mxu2 }
 0x15f   : > { %v520_v1 = vpop.f32.mrf.mxu3  ;;  %v516_v19 = vadd.f32 %v515_v14, %v444_v18 }
 0x160   : > { %v521_v12 = vadd.f32 %v520_v1, %v454_v10 }
 0x161   : > { %v531_v27 = vmax.f32 %v516_v19, 0.0 }
 0x162   : > { %v533_v20 = vmax.f32 %v521_v12, 0.0 }
 0x163   : > { %v538_v33 = vpack.c.bf16 %v531_v27, %v530_v31 }
 0x164   : > { %v539_v28 = vpack.c.bf16 %v533_v20, %v532_v24 }
 0x167   : > { %v523_v5 = vpop.f32.mrf.mxu3 }
 0x168   : > { %v524_v9 = vadd.f32 %v523_v5, %v459_v3 }
 0x16a   : > { %v534_v16 = vmax.f32 %v524_v9, 0.0 }
 0x16f   : > { %v525_v11 = vpop.f32.mrf.mxu3 }
 0x170   : > { %v526_v13 = vadd.f32 %v525_v11, %v464_v2 }
 0x172   : > { %v535_v17 = vmax.f32 %v526_v13, 0.0 }
 0x174   : > { %v540_v21 = vpack.c.bf16 %v535_v17, %v534_v16 }
 0x176   : > { %554 = vmatpush.bf16.msrb.mxu2 %v540_v21 }
 0x17a   : > { %555 = vmatpush.bf16.msrb.mxu2 %v539_v28 }
 0x17e   : > { %556 = vmatpush.bf16.msrb.mxu2 %v538_v33 }
 0x182   : > { %557 = vmatpush.bf16.msrb.mxu2 %v537_v35 }
 0x185   : > { %726 = vmatmul.msk.bf16.vlgmr.msrb.gmra.mxu2 %vm486_vm2, %v536_v36 }
 0x208   : > { %v559_v40 = vpop.f32.mrf.mxu2 }
 0x209   : > { %v560_v41 = vadd.f32 %v559_v40, %v545_v39 }
 0x20b   : > { %v568_v42 = vsel %vm565_vm3, %v560_v41, -1e+30  ;;  %v602_v6 = vsel %vm599_vm7, %v560_v41, 0.0 }
 0x20c   : > { %v569_v43 = vrot.slane %v568_v42, 4 }
 0x20e   : > { %v570_v44 = vmax.f32 %v568_v42, %v569_v43 }
 0x210   : > { %v571_v45 = vrot.slane %v570_v44, 2  ;;  %v561_v46 = vpop.f32.mrf.mxu2 }
 0x212   : > { %v572_v47 = vmax.f32 %v570_v44, %v571_v45 }
 0x214   : > { %v573_v48 = vrot.slane %v572_v47, 1 }
 0x216   : > { %v574_v49 = vmax.f32 %v572_v47, %v573_v48 }
 0x218   : > { %v575_v50 = vsub.f32 %v568_v42, %v574_v49 }
 0x21a   : > { %v576_v51 = vmul.f32 1.442695, %v575_v50 }
 0x21c   : > { %791 = vpow2.f32 %v576_v51 }
 0x222   : > { %v792_v52 = vpop.eup %791 }
 0x223   : > { %v578_v53 = vrot.slane %v792_v52, 4 }
 0x225   : > { %v579_v54 = vadd.f32 %v792_v52, %v578_v53 }
 0x227   : > { %v580_v55 = vrot.slane %v579_v54, 2 }
 0x229   : > { %v581_v56 = vadd.f32 %v580_v55, %v579_v54 }
 0x22b   : > { %v582_v57 = vrot.slane %v581_v56, 1 }
 0x22d   : > { %v583_v58 = vadd.f32 %v582_v57, %v581_v56 }
 0x22f   : > { %793 = vrcp.f32 %v583_v58  ;;  %v595_v62 = vand.u32 2147483648, %v583_v58  ;;  %v593_v0 = vand.u32 2147483647, %v583_v58  ;;  %vm589_vm5 = vweird.f32 %v583_v58 }
 0x231   : > { %v596_v2 = vor.u32 1.1754944e-38, %v595_v62  ;;  %vm594_vm8 = vcmp.eq.f32.partialorder %v593_v0, 8.507059e+37 }
 0x235   : > { %v794_v59 = vpop.eup %793 }
 0x236   : > { %v585_v60 = vmul.f32 %v794_v59, %v583_v58  ;;  %vm590_vm4 = vweird.f32 %v794_v59 }
 0x237   : > { %vm591_vm6 = vmor %vm589_vm5, %vm590_vm4 }
 0x238   : > { %v586_v61 = vsub.f32 1.0, %v585_v60 }
 0x23a   : > { %v587_v63 = vmul.f32 %v794_v59, %v586_v61 }
 0x23c   : > { %v588_v1 = vadd.f32 %v794_v59, %v587_v63 }
 0x23e   : > { %v592_v3 = vsel %vm591_vm6, %v794_v59, %v588_v1 }
 0x23f   : > { %v597_v4 = vsel %vm594_vm8, %v596_v2, %v592_v3 }
 0x240   : > { %v598_v5 = vmul.f32 %v792_v52, %v597_v4 }
 0x242   : > { %v603_v7 = vsel %vm565_vm3, %v598_v5, %v602_v6 }
 0x243   : > { %604 = vst [vmem:[%s269_s20] sm:$0xff] %v603_v7 }
 0x244   : > { %822 = shalt.err (!%p819_p3)
}
 0x245   : > { %748 = dma.vmem_to_hbm [thread:$0]  (%p938_p5), %s619_s21, 128, %s621_s22, %s606_s28  }
 0x246 PF: > { %p754_p4 = scmp.ge.s32.totalorder %s857_s27, 2  ;;  %s632_s14 = sand.u32 1, %s845_s24  }
 0x247   : > { %s633_s17 = scalar_lea.sflag [#allocation3], %s632_s14 }
 0x248   : > { %p751_p7 = pnand %p754_p4, %p942_p6 }
 0x24a   : > { %p752_p8 = pneg %p751_p7 }
 0x24c   : > { %840 = dma.done.wait (%p752_p8), %s633_s17, 128  }
 0x24d   : > { %842 = vsyncadd (%p752_p8), %s633_s17, 4294967168  ;;  %p17_p9 = scmp.ge.s32.totalorder %s925_s30, 4   ;;  %s1084_s24 = smov %s849_s25 }
 0x24e   : > { %s1085_s25 = smov %s853_s26  ;;  %s1086_s26 = smov %s936_s10 }
 0x24f   : > { %s1087_s27 = smov %s925_s30  ;;  %19 = sbr.rel (!%p17_p9) target bundleno = 3 (0x3), region = 83 }
 0x254   :  { %639 = vsyncpa [#allocation3], 1 }
 0x255   :  { %641 = vsyncpa [#allocation3 + $0x1], 1 }

</bundles_post_ra>
